<compile_context>
chip_gen: v5e
topology: v5e:2x2
jax: 0.10.0
libtpu: 0.0.40
codegen_flags: <defaults>
</compile_context>

<pallas_src>
import functools

import jax
import jax.numpy as jnp
from jax.experimental import pallas as pl
from jax.experimental.pallas import tpu as pltpu

n_embd = 84
block_size = 64


def _head_kernel(x_ref, w_ref, o_ref, *, scale, head_size):
    # x_ref block: (BT, T, Cp)  w_ref block: (Cp, 3H)  o_ref block: (BT, T, H)
    x = x_ref[...]                      # f32 (BT, T, Cp)
    w = w_ref[...]                      # f32 (Cp, 3H)
    H = head_size
    BT, T, Cp = x.shape                 # static python ints

    # Fused K/Q/V projection: one wide MXU matmul instead of three narrow ones.
    x2 = x.reshape(BT * T, Cp)
    kqv = jnp.dot(x2, w, preferred_element_type=jnp.float32)   # (BT*T, 3H)
    kqv = kqv.reshape(BT, T, 3 * H)
    k = kqv[:, :, 0:H]
    q = kqv[:, :, H:2 * H]
    v = kqv[:, :, 2 * H:3 * H]

    # Scores: batched dot contracting the last (head) dims — no k transpose.
    wei = jnp.einsum('bth,bsh->bts', q, k,
                     preferred_element_type=jnp.float32) * scale   # (BT, T, T)

    # Causal (lower-triangular) mask; finite large-negative is NaN-safe and
    # underflows to exactly 0 after exp.
    row = jax.lax.broadcasted_iota(jnp.int32, (T, T), 0)
    col = jax.lax.broadcasted_iota(jnp.int32, (T, T), 1)
    wei = jnp.where(col <= row, wei, -1e30)

    # Softmax along keys; denominator via EUP approximate reciprocal.
    wei = wei - jnp.max(wei, axis=-1, keepdims=True)
    p = jnp.exp(wei)
    denom = jnp.sum(p, axis=-1, keepdims=True)
    p = p * pl.reciprocal(denom, approx=True)

    # dropout(p=0.0) is the identity — skipped.

    out = jnp.einsum('bts,bsh->bth', p, v,
                     preferred_element_type=jnp.float32)           # (BT, T, H)
    o_ref[...] = out.astype(o_ref.dtype)


def head_forward(x, w_key, w_query, w_value, *, bt_max=64):
    """x: (B, T, C) f32; w_*: (C, head_size) f32 (== nn.Linear weight.T).

    Returns (B, T, head_size).
    """
    B, T, C = x.shape
    H = w_key.shape[1]
    assert T <= block_size, "T must not exceed block_size"

    # Pad the contraction dim to a multiple of 128 lanes (zero pad => exact).
    Cp = ((C + 127) // 128) * 128
    w_kqv = jnp.concatenate([w_key, w_query, w_value], axis=1)       # (C, 3H)
    w_kqv = jnp.pad(w_kqv, ((0, Cp - C), (0, 0)))                    # (Cp, 3H)
    xp = jnp.pad(x, ((0, 0), (0, 0), (0, Cp - C)))                   # (B, T, Cp)

    # Batch tile: many sequences per grid step; pad B if needed (zero rows are
    # harmless and sliced off afterwards).
    BT = min(B, bt_max)
    Bp = ((B + BT - 1) // BT) * BT
    if Bp != B:
        xp = jnp.pad(xp, ((0, Bp - B), (0, 0), (0, 0)))

    kernel = functools.partial(_head_kernel,
                               scale=float(C) ** (-0.5),
                               head_size=H)

    out = pl.pallas_call(
        kernel,
        out_shape=jax.ShapeDtypeStruct((Bp, T, H), x.dtype),
        grid_spec=pltpu.PrefetchScalarGridSpec(
            num_scalar_prefetch=0,
            grid=(Bp // BT,),
            in_specs=[
                pl.BlockSpec((BT, T, Cp), lambda b: (b, 0, 0)),
                pl.BlockSpec((Cp, 3 * H), lambda b: (0, 0)),
            ],
            out_specs=pl.BlockSpec((BT, T, H), lambda b: (b, 0, 0)),
        ),
        compiler_params=pltpu.CompilerParams(
            dimension_semantics=("parallel",)),
    )(xp, w_kqv)

    return out[:B] if Bp != B else out


def head_reference(x, w_key, w_query, w_value):
    """Pure-JAX reference matching the PyTorch forward exactly."""
    B, T, C = x.shape
    k = x @ w_key
    q = x @ w_query
    v = x @ w_value
    wei = (q @ jnp.swapaxes(k, -2, -1)) * (C ** (-0.5))
    tril = jnp.tril(jnp.ones((T, T)))
    wei = jnp.where(tril == 0, -jnp.inf, wei)
    wei = jax.nn.softmax(wei, axis=-1)
    return wei @ v


if __name__ == "__main__":
    head_size = 16
    key = jax.random.PRNGKey(0)
    kx, kk, kq, kv, kx2 = jax.random.split(key, 5)

    # Deterministic "Linear" weights, stored as (C, head_size) == W.T
    C = n_embd
    w_key = jax.random.normal(kk, (C, head_size), dtype=jnp.float32) * 0.1
    w_query = jax.random.normal(kq, (C, head_size), dtype=jnp.float32) * 0.1
    w_value = jax.random.normal(kv, (C, head_size), dtype=jnp.float32) * 0.1

    # Small demo shape (B=2, T=8) plus a full-block check (B=4, T=block_size).
    ok = True
    for (B, T, kseed) in [(2, 8, kx), (4, block_size, kx2)]:
        x = jax.random.normal(kseed, (B, T, C), dtype=jnp.float32)
        out = head_forward(x, w_key, w_query, w_value)
        out = jax.block_until_ready(out)
        ref = head_reference(x, w_key, w_query, w_value)
        assert out.shape == (B, T, head_size)
        # 2e-3 tolerance accounts for the approximate (EUP) reciprocal.
        ok &= bool(jnp.allclose(out, ref, atol=2e-3, rtol=2e-3))

    assert ok, "mismatch vs reference"
    print("KERNEL_OK")
</pallas_src>

<mosaic_0001>
module attributes {stable_mosaic.version = 11 : i64} {
  func.func @_head_kernel(%arg0: i32, %arg1: memref<2x8x128xf32, #tpu.memory_space<vmem>>, %arg2: memref<128x48xf32, #tpu.memory_space<vmem>>, %arg3: memref<2x8x16xf32, #tpu.memory_space<vmem>>) attributes {dimension_semantics = [#tpu.dimension_semantics<parallel>], iteration_bounds = array<i64: 1>, scalar_prefetch = 0 : i64, scratch_operands = 0 : i64, tpu.core_type = #tpu.core_type<tc>, window_params = [{transform_indices = @transform_0, window_bounds = array<i64: 2, 8, 128>}, {pipeline_mode = #tpu.pipeline_mode<synchronous>, transform_indices = @transform_1, window_bounds = array<i64: 128, 48>}, {transform_indices = @transform_2, window_bounds = array<i64: 2, 8, 16>}]} {
    %c0 = arith.constant 0 : index
    %c0_0 = arith.constant 0 : index
    %c0_1 = arith.constant 0 : index
    %0 = vector.load %arg1[%c0, %c0_0, %c0_1] : memref<2x8x128xf32, #tpu.memory_space<vmem>>, vector<2x8x128xf32>
    %c0_2 = arith.constant 0 : index
    %c0_3 = arith.constant 0 : index
    %1 = vector.load %arg2[%c0_2, %c0_3] : memref<128x48xf32, #tpu.memory_space<vmem>>, vector<128x48xf32>
    %2 = vector.shape_cast %0 : vector<2x8x128xf32> to vector<16x128xf32>
    %cst = arith.constant dense<0.000000e+00> : vector<16x48xf32>
    %3 = tpu.matmul %2, %1, %cst {dimension_numbers = #tpu.dot_dimension_numbers<[1], [0], [0], [1], [0, 0, 1, 1], [], []>} : vector<16x128xf32>, vector<128x48xf32>, vector<16x48xf32> -> vector<16x48xf32>
    %4 = vector.shape_cast %3 : vector<16x48xf32> to vector<2x8x48xf32>
    %5 = vector.extract_strided_slice %4 {offsets = [0, 0, 0], sizes = [2, 8, 16], strides = [1, 1, 1]} : vector<2x8x48xf32> to vector<2x8x16xf32>
    %6 = vector.extract_strided_slice %4 {offsets = [0, 0, 16], sizes = [2, 8, 16], strides = [1, 1, 1]} : vector<2x8x48xf32> to vector<2x8x16xf32>
    %7 = vector.extract_strided_slice %4 {offsets = [0, 0, 32], sizes = [2, 8, 16], strides = [1, 1, 1]} : vector<2x8x48xf32> to vector<2x8x16xf32>
    "tpu.trace_start"() <{level = 10 : i32, message = "bth,bsh->bts"}> : () -> ()
    %cst_4 = arith.constant dense<0.000000e+00> : vector<2x8x8xf32>
    %8 = tpu.matmul %6, %5, %cst_4 {dimension_numbers = #tpu.dot_dimension_numbers<[2], [2], [1], [1], [0, 0, 0, 1, 1, 1], [0], [0]>} : vector<2x8x16xf32>, vector<2x8x16xf32>, vector<2x8x8xf32> -> vector<2x8x8xf32>
    "tpu.trace_stop"() : () -> ()
    %cst_5 = arith.constant 0.109108947 : f32
    %9 = vector.broadcast %cst_5 : f32 to vector<2x8x8xf32>
    %10 = arith.mulf %8, %9 : vector<2x8x8xf32>
    %11 = tpu.iota {dimensions = array<i32: 0>} : vector<8x8xi32>
    %12 = tpu.iota {dimensions = array<i32: 1>} : vector<8x8xi32>
    %13 = arith.cmpi sle, %12, %11 : vector<8x8xi32>
    %cst_6 = arith.constant -1.000000e+30 : f32
    %14 = vector.shape_cast %13 : vector<8x8xi1> to vector<1x8x8xi1>
    %15 = vector.broadcast %14 : vector<1x8x8xi1> to vector<2x8x8xi1>
    %16 = vector.broadcast %cst_6 : f32 to vector<2x8x8xf32>
    %17 = arith.select %15, %10, %16 : vector<2x8x8xi1>, vector<2x8x8xf32>
    %cst_7 = arith.constant dense<0xFF800000> : vector<2x8xf32>
    %18 = vector.multi_reduction <maximumf>, %17, %cst_7 [2] : vector<2x8x8xf32> to vector<2x8xf32>
    %19 = vector.shape_cast %18 : vector<2x8xf32> to vector<2x8x1xf32>
    %20 = vector.broadcast %19 : vector<2x8x1xf32> to vector<2x8x8xf32>
    %21 = arith.subf %17, %20 : vector<2x8x8xf32>
    %22 = math.exp %21 : vector<2x8x8xf32>
    %cst_8 = arith.constant dense<0.000000e+00> : vector<2x8xf32>
    %23 = vector.multi_reduction <add>, %22, %cst_8 [2] : vector<2x8x8xf32> to vector<2x8xf32>
    %24 = vector.shape_cast %23 : vector<2x8xf32> to vector<2x8x1xf32>
    %25 = tpu.reciprocal %24 {approx = true} : vector<2x8x1xf32> -> vector<2x8x1xf32>
    %26 = vector.broadcast %25 : vector<2x8x1xf32> to vector<2x8x8xf32>
    %27 = arith.mulf %22, %26 : vector<2x8x8xf32>
    "tpu.trace_start"() <{level = 10 : i32, message = "bts,bsh->bth"}> : () -> ()
    %cst_9 = arith.constant dense<0.000000e+00> : vector<2x8x16xf32>
    %28 = tpu.matmul %27, %7, %cst_9 {dimension_numbers = #tpu.dot_dimension_numbers<[2], [1], [1], [2], [0, 0, 0, 1, 1, 2], [0], [0]>} : vector<2x8x8xf32>, vector<2x8x16xf32>, vector<2x8x16xf32> -> vector<2x8x16xf32>
    "tpu.trace_stop"() : () -> ()
    %c0_10 = arith.constant 0 : index
    %c0_11 = arith.constant 0 : index
    %c0_12 = arith.constant 0 : index
    %29 = vector.load %arg3[%c0_10, %c0_11, %c0_12] : memref<2x8x16xf32, #tpu.memory_space<vmem>>, vector<2x8x16xf32>
    tpu.vector_store %arg3[%c0_10, %c0_11, %c0_12], %28 {strides = array<i32>} : memref<2x8x16xf32, #tpu.memory_space<vmem>>, vector<2x8x16xf32>,
    return
  }
  func.func @transform_0(%arg0: i32) -> (i32, i32, i32) {
    %c0_i32 = arith.constant 0 : i32
    %c0_i32_0 = arith.constant 0 : i32
    %c0_i32_1 = arith.constant 0 : i32
    return %arg0, %c0_i32, %c0_i32_0 : i32, i32, i32
  }
  func.func @transform_1(%arg0: i32) -> (i32, i32) {
    %c0_i32 = arith.constant 0 : i32
    %c0_i32_0 = arith.constant 0 : i32
    %c0_i32_1 = arith.constant 0 : i32
    return %c0_i32, %c0_i32_0 : i32, i32
  }
  func.func @transform_2(%arg0: i32) -> (i32, i32, i32) {
    %c0_i32 = arith.constant 0 : i32
    %c0_i32_0 = arith.constant 0 : i32
    %c0_i32_1 = arith.constant 0 : i32
    return %arg0, %c0_i32, %c0_i32_0 : i32, i32, i32
  }
}

</mosaic_0001>

<bundles_post_ra>
// kernel: tpu_custom_call.1
= control target key start
LH: loop header
LB: loop body
LE: loop exit
PB: predicated region body
PF: predicated region fallthrough
CT: control target
= control target key end

     0   :  { %s348_s0 = inlined_call_operand.vmem [shape: f32[2,8,128], index: 0, kind: input, shape index: {}]   ;;  %s349_s1 = inlined_call_operand.vmem [shape: f32[128,48], index: 1, kind: input, shape index: {}]   ;;  %s350_s2 = inlined_call_operand.hbm [shape: f32[2,8,16], index: 2, kind: output, shape index: {}]  }
   0x1   :  { %v29_v0 = vld [vmem:[%s349_s1 + $0x78] sm:$0xff]  ;;  %v28_v1 = vld [vmem:[%s349_s1 + $0x70] sm:$0xff]  ;;  %v27_v2 = vld [vmem:[%s349_s1 + $0x68] sm:$0xff] }
   0x2   :  { %30 = vmatpush.msra.mxu0 %v29_v0  ;;  %v26_v3 = vld [vmem:[%s349_s1 + $0x60] sm:$0xff]  ;;  %v25_v4 = vld [vmem:[%s349_s1 + $0x58] sm:$0xff] }
   0x4   :  { %31 = vmatpush.msra.mxu0 %v28_v1 }
   0x6   :  { %32 = vmatpush.msra.mxu0 %v27_v2 }
   0x7   :  { %7 = vsyncpa [#allocation3], 0  ;;  %v24_v5 = vld [vmem:[%s349_s1 + $0x50] sm:$0xff]  ;;  %v23_v6 = vld [vmem:[%s349_s1 + $0x48] sm:$0xff]  ;;  %vm56_vm0 = vcmask 130048   ;;  %s259_s17 = smov 112   ;;  %v110_v23 = vlaneseq }
   0x8   :  { %33 = vmatpush.msra.mxu0 %v26_v3  ;;  %v22_v7 = vld [vmem:[%s349_s1 + $0x40] sm:$0xff]  ;;  %v21_v8 = vld [vmem:[%s349_s1 + $0x38] sm:$0xff]  ;;  %v20_v9 = vld [vmem:[%s349_s1 + $0x30] sm:$0xff]  ;;  %vm119_vm2 = vcmask 64512   ;;  %s202_s21 = sshll.u32 %s350_s2, 4  ;;  %s262_s22 = smov 128   ;;  %s203_s21 = int_to_ptr.hbm [resolvable:$true] %s202_s21 }
   0x9   :  { %v19_v10 = vld [vmem:[%s349_s1 + $0x28] sm:$0xff]  ;;  %v18_v11 = vld [vmem:[%s349_s1 + $0x20] sm:$0xff]  ;;  %v17_v12 = vld [vmem:[%s349_s1 + $0x18] sm:$0xff]  ;;  %v111_v24 = vshrl.u32 %v110_v23, 7  ;;  %v113_v25 = vand.u32 127, %v110_v23  ;;  %s263_s23 = smov 8  }
   0xa   :  { %34 = vmatpush.msra.mxu0 %v25_v4  ;;  %v16_v13 = vld [vmem:[%s349_s1 + $0x10] sm:$0xff]  ;;  %v15_v14 = vld [vmem:[%s349_s1 + $0x8] sm:$0xff]  ;;  %v14_v15 = vld [vmem:[%s349_s1] sm:$0xff]  ;;  %s260_s1 = smov 96  }
   0xb   :  { %v12_v16 = vld [vmem:[%s348_s0] sm:$0xff]  ;;  %v13_v17 = vld [vmem:[%s348_s0 + $0x8] sm:$0xff]  ;;  %vm114_vm1 = vcmp.le.s32.totalorder %v113_v25, %v111_v24  ;;  %s261_s0 = smov [#allocation2]  }
   0xc   :  { %35 = vmatpush.msra.mxu0 %v24_v5  ;;  %s200_s18 = sshll.u32 %s261_s0, 4  ;;  %s201_s18 = int_to_ptr.vmem [resolvable:$true] %s200_s18 }
   0xe   :  { %36 = vmatpush.msra.mxu0 %v23_v6 }
  0x10   :  { %37 = vmatpush.msra.mxu0 %v22_v7 }
  0x12   :  { %38 = vmatpush.msra.mxu0 %v21_v8 }
  0x14   :  { %39 = vmatpush.msra.mxu0 %v20_v9 }
  0x16   :  { %40 = vmatpush.msra.mxu0 %v19_v10 }
  0x18   :  { %41 = vmatpush.msra.mxu0 %v18_v11 }
  0x1a   :  { %42 = vmatpush.msra.mxu0 %v17_v12 }
  0x1c   :  { %43 = vmatpush.msra.mxu0 %v16_v13 }
  0x1e   :  { %44 = vmatpush.msra.mxu0 %v15_v14 }
  0x20   :  { %45 = vmatpush.msra.mxu0 %v14_v15 }
  0x21   :  { %46 = vmatmul.f32.vlgmr.msra.gmra.mxu0 %v12_v16 }
  0x29   :  { %49 = vmatmul.f32.gmra.mxu0 %v13_v17 }
  0x9e   :  { %v47_v18 = vpop.f32.mrf.mxu0 }
  0x9f   :  { %54 = vrot.lane.b32.xlu0 %v47_v18, %s259_s17  ;;  %214 = vmatpush.xpose.msk.msra.mxu1 %vm56_vm0, %v47_v18 }
  0xa6   :  { %v50_v19 = vpop.f32.mrf.mxu0 }
  0xa7   :  { %82 = vrot.lane.b32.xlu0 %v50_v19, %s259_s17  ;;  %216 = vmatpush.xpose.msk.msra.mxu2 %vm56_vm0, %v50_v19 }
  0xaf   :  { %142 = vrot.lane.b32.xlu0 %v47_v18, %s260_s1 }
 0x111   :  { %v55_v20 = vpop.permute.xlu0 %54 }
 0x112   :  { %215 = vmatmul.msk.f32.vlgmr.msra.gmra.mxu1 %vm56_vm0, %v55_v20 }
 0x119   :  { %v83_v21 = vpop.permute.xlu0 %82 }
 0x11a   :  { %217 = vmatmul.msk.f32.vlgmr.msra.gmra.mxu2 %vm56_vm0, %v83_v21 }
 0x121   :  { %v143_v22 = vpop.permute.xlu0 %142 }
 0x122   :  { %163 = vmatpush.msra.mxu3 %v143_v22 }
 0x18f   :  { %v78_v26 = vpop.f32.mrf.mxu1 }
 0x190   :  { %v108_v27 = vmul.f32 0.10910895, %v78_v26 }
 0x192   :  { %v117_v28 = vsel %vm114_vm1, %v108_v27, -1e+30 }
 0x193   :  { %v120_v29 = vsel %vm119_vm2, %v117_v28, -inf }
 0x194   :  { %121 = vmax.xlane.f32.xlu1 %v120_v29 }
 0x19d   :  { %v105_v30 = vpop.f32.mrf.mxu2 }
 0x19e   :  { %v109_v31 = vmul.f32 0.10910895, %v105_v30 }
 0x1a0   :  { %v118_v32 = vsel %vm114_vm1, %v109_v31, -1e+30 }
 0x1a1   :  { %v123_v33 = vsel %vm119_vm2, %v118_v32, -inf }
 0x1a2   :  { %124 = vmax.xlane.f32.xlu1 %v123_v33 }
 0x1bb   :  { %168 = vrot.lane.b32.xlu1 %v50_v19, %s260_s1 }
 0x207   :  { %v122_v34 = vpop.xlane.xlu1 %121 }
 0x208   :  { %v126_v35 = vsub.f32 %v117_v28, %v122_v34 }
 0x20a   :  { %v128_v36 = vmul.f32 1.442695, %v126_v35 }
 0x20c   :  { %225 = vpow2.f32 %v128_v36 }
 0x212   :  { %v226_v37 = vpop.eup %225 }
 0x213   :  { %v132_v38 = vsel %vm119_vm2, %v226_v37, 0.0 }
 0x214   :  { %133 = vadd.xlane.f32.xlu2 %v132_v38 }
 0x215   :  { %v125_v39 = vpop.xlane.xlu1 %124 }
 0x216   :  { %v127_v40 = vsub.f32 %v118_v32, %v125_v39 }
 0x218   :  { %v130_v41 = vmul.f32 1.442695, %v127_v40 }
 0x21a   :  { %227 = vpow2.f32 %v130_v41 }
 0x220   :  { %v228_v42 = vpop.eup %227 }
 0x221   :  { %v135_v43 = vsel %vm119_vm2, %v228_v42, 0.0 }
 0x222   :  { %136 = vadd.xlane.f32.xlu2 %v135_v43 }
 0x22d   :  { %v169_v44 = vpop.permute.xlu1 %168 }
 0x22e   :  { %189 = vmatpush.msrb.mxu3 %v169_v44 }
 0x287   :  { %v134_v45 = vpop.xlane.xlu2 %133 }
 0x288   :  { %229 = vrcp.f32 %v134_v45 }
 0x28e   :  { %v230_v46 = vpop.eup %229 }
 0x28f   :  { %v140_v47 = vmul.f32 %v230_v46, %v226_v37 }
 0x291   :  { %218 = vmatmul.msk.f32.vlgmr.msra.gmra.mxu3 %vm119_vm2, %v140_v47 }
 0x295   :  { %v137_v48 = vpop.xlane.xlu2 %136 }
 0x296   :  { %231 = vrcp.f32 %v137_v48 }
 0x29c   :  { %v232_v49 = vpop.eup %231 }
 0x29d   :  { %v141_v50 = vmul.f32 %v232_v49, %v228_v42 }
 0x29f   :  { %219 = vmatmul.msk.f32.vlgmr.msrb.gmra.mxu3 %vm119_vm2, %v141_v50 }
 0x314   :  { %v165_v51 = vpop.f32.mrf.mxu3 }
 0x315   :  { %194 = vst.msk [vmem:[#allocation2] sm:$0xff] %vm56_vm0, %v165_v51 }
 0x322   :  { %v191_v52 = vpop.f32.mrf.mxu3 }
 0x323   :  { %195 = vst.msk [vmem:[#allocation2 + $0x8] sm:$0xff] %vm56_vm0, %v191_v52 }
 0x324   :  { %208 = dma.vmem_to_hbm [thread:$0]  %s201_s18, 256, %s203_s21, [#allocation3], %s262_s22, %s262_s22, %s263_s23  }
 0x325   :  { %257 = dma.done.wait [#allocation3], 256  }
 0x326   :  { %258 = vsyncadd [#allocation3], 4294967040 }
 0x327   :  { %213 = vsyncpa [#allocation3], 1 }

</bundles_post_ra>
